<compile_context>
chip_gen: v7x
topology: tpu7x:2x2x1
jax: 0.10.0
libtpu: 0.0.40
codegen_flags: <defaults>
</compile_context>

<pallas_src>
import jax
import jax.numpy as jnp
from jax.experimental import pallas as pl
from jax.experimental.pallas import tpu as pltpu


# --------------------------------- helpers ----------------------------------
def _round_up(x, m):
    return ((x + m - 1) // m) * m


def _pick_tile(total, preferred):
    """Largest multiple of 128 <= preferred that divides `total` (a multiple
    of 128)."""
    t = min(preferred, total)
    t = (t // 128) * 128
    while t > 128 and total % t:
        t -= 128
    return max(t, 128)


def _vmem_budget_bytes():
    """~80% of physical VMEM (leaves compiler headroom); conservative if the
    hardware query is unavailable."""
    cap = 64 << 20
    try:
        info = pltpu.get_tpu_info()
        cap = int(getattr(info, "vmem_capacity_bytes", cap))
    except Exception:
        pass
    return max(int(cap * 0.8), 32 << 20)


# ------------------------ kernel A: X @ W (+ bias) ---------------------------
def _matmul_bias_kernel(x_ref, w_ref, b_ref, o_ref):
    o_ref[...] = (
        jnp.dot(x_ref[...], w_ref[...], preferred_element_type=jnp.float32)
        + b_ref[...]
    ).astype(o_ref.dtype)


def _matmul_bias(x, w, bias2d, out_dtype, tile_row, tile_n, vmem_limit):
    """x: (B, Np, K), w: (K, Mp), bias2d: (1, Mp) f32 -> (B, Np, Mp)."""
    B, Np, K = x.shape
    Mp = w.shape[1]
    # TODO(synk): tile K with an accumulator for very large F_in (>8k) layers.
    return pl.pallas_call(
        _matmul_bias_kernel,
        out_shape=jax.ShapeDtypeStruct((B, Np, Mp), out_dtype),
        grid_spec=pltpu.PrefetchScalarGridSpec(
            num_scalar_prefetch=0,
            grid=(B, Np // tile_row, Mp // tile_n),
            in_specs=[
                pl.BlockSpec((None, tile_row, K), lambda b, i, j: (b, i, 0)),
                pl.BlockSpec((K, tile_n), lambda b, i, j: (0, j)),
                pl.BlockSpec((1, tile_n), lambda b, i, j: (0, j)),
            ],
            out_specs=pl.BlockSpec(
                (None, tile_row, tile_n), lambda b, i, j: (b, i, j)
            ),
        ),
        compiler_params=pltpu.CompilerParams(
            dimension_semantics=("parallel", "parallel", "parallel"),
            vmem_limit_bytes=vmem_limit,
        ),
        cost_estimate=pl.CostEstimate(
            flops=2 * B * Np * K * Mp,
            transcendentals=0,
            bytes_accessed=int(
                x.size * x.dtype.itemsize
                + w.size * w.dtype.itemsize
                + B * Np * Mp * jnp.dtype(out_dtype).itemsize
            ),
        ),
    )(x, w, bias2d)


# -------------- kernel B: (adj @ H) / (rowsum(adj) + 1) + bias ---------------
def _make_agg_kernel(tile_k, resident):
    def kernel(adj_ref, hid_ref, b_ref, o_ref, acc_ref, rsum_ref):
        k = pl.program_id(2)

        @pl.when(k == 0)
        def _init():
            acc_ref[...] = jnp.zeros_like(acc_ref)
            rsum_ref[...] = jnp.zeros_like(rsum_ref)

        adj = adj_ref[...]  # (tile_row, tile_k)
        if resident:
            # Per-batch hidden slab is VMEM-resident; slice the k-th chunk.
            off = pl.multiple_of(k * tile_k, tile_k)
            h = hid_ref[pl.ds(off, tile_k), :]
        else:
            h = hid_ref[...]

        # Partial adj @ H on the MXU (f32 accumulation).
        acc_ref[...] += jnp.dot(adj, h, preferred_element_type=jnp.float32)
        # Matching partial adj row-sums (XLU; one pass over adj).
        rsum_ref[...] += jnp.sum(adj.astype(jnp.float32), axis=1, keepdims=True)

        @pl.when(k == pl.num_programs(2) - 1)
        def _finalize():
            denom = rsum_ref[...] + 1.0  # exact divide: runs once per tile
            o_ref[...] = (acc_ref[...] / denom + b_ref[...]).astype(o_ref.dtype)

    return kernel


def _aggregate(adj, hidden, bias2d, out_dtype, tile_row, tile_k, budget):
    """adj: (B, Np, Np), hidden: (B, Np, Fp), bias2d: (1, Fp) f32."""
    B, Np, _ = adj.shape
    Fp = hidden.shape[-1]
    out_isz = jnp.dtype(out_dtype).itemsize

    # Keep the whole per-batch hidden slab resident if it fits the budget
    # (double-buffered slabs + adj/out blocks + scratch + headroom).
    resident_need = (
        2 * Np * Fp * hidden.dtype.itemsize
        + 2 * tile_row * tile_k * adj.dtype.itemsize
        + 2 * tile_row * Fp * out_isz
        + tile_row * Fp * 4
        + tile_row * 4
        + 2 * Fp * 4
        + (4 << 20)
    )
    resident = resident_need <= budget

    if resident:
        hid_spec = pl.BlockSpec((None, Np, Fp), lambda b, i, k: (b, 0, 0))
        hid_reads = B
    else:
        hid_spec = pl.BlockSpec((None, tile_k, Fp), lambda b, i, k: (b, k, 0))
        hid_reads = B * (Np // tile_row)

    return pl.pallas_call(
        _make_agg_kernel(tile_k, resident),
        out_shape=jax.ShapeDtypeStruct((B, Np, Fp), out_dtype),
        grid_spec=pltpu.PrefetchScalarGridSpec(
            num_scalar_prefetch=0,
            grid=(B, Np // tile_row, Np // tile_k),
            in_specs=[
                pl.BlockSpec((None, tile_row, tile_k), lambda b, i, k: (b, i, k)),
                hid_spec,
                pl.BlockSpec((1, Fp), lambda b, i, k: (0, 0)),
            ],
            out_specs=pl.BlockSpec((None, tile_row, Fp), lambda b, i, k: (b, i, 0)),
            scratch_shapes=[
                pltpu.VMEM((tile_row, Fp), jnp.float32),  # adj@H accumulator
                pltpu.VMEM((tile_row, 1), jnp.float32),   # adj row-sum accumulator
            ],
        ),
        compiler_params=pltpu.CompilerParams(
            dimension_semantics=("parallel", "parallel", "arbitrary"),
            vmem_limit_bytes=budget,
        ),
        cost_estimate=pl.CostEstimate(
            flops=2 * B * Np * Np * Fp + B * Np * Np,
            transcendentals=0,
            bytes_accessed=int(
                adj.size * adj.dtype.itemsize
                + hid_reads * Np * Fp * hidden.dtype.itemsize
                + B * Np * Fp * out_isz
            ),
        ),
    )(adj, hidden, bias2d)


# --------------------------------- wrapper ----------------------------------
def graph_convolution(text, adj, weight, bias=None):
    """text: (B, N, F_in), adj: (B, N, N), weight: (F_in, F_out), bias: (F_out,)|None.

    out = (adj @ (text @ W)) / (sum(adj, -1, keepdims=True) + 1) [+ bias]
    """
    B, N, F_in = text.shape
    F_out = weight.shape[1]
    out_dtype = text.dtype
    budget = _vmem_budget_bytes()

    # Node-dim padding & decoupled row/contraction tiles.  Pad N only to a
    # multiple of 128 (or 8 for tiny graphs) so the adj zero-pad blow-up stays
    # small; tiles shrink to divide N_p instead.
    if N < 128:
        N_p = _round_up(max(N, 1), 8)
        tile_row = tile_k = N_p
    else:
        N_p = _round_up(N, 128)
        tile_row = _pick_tile(N_p, 256)
        tile_k = _pick_tile(N_p, 512)

    adj_p = adj
    if N_p != N:
        # TODO(synk): fully pad-free ragged edge via in-kernel iota masking.
        adj_p = jnp.pad(adj, ((0, 0), (0, N_p - N), (0, N_p - N)))

    F_out_p = _round_up(F_out, 128)
    tile_n = _pick_tile(F_out_p, 512)

    if bias is None:
        bias_out = jnp.zeros((1, F_out_p), jnp.float32)
    else:
        bias_out = jnp.pad(
            bias.reshape(1, F_out).astype(jnp.float32),
            ((0, 0), (0, F_out_p - F_out)),
        )

    if F_out <= F_in:
        # Order A: hidden = text @ W first, then aggregate (bias fused there).
        text_p = text if N_p == N else jnp.pad(text, ((0, 0), (0, N_p - N), (0, 0)))
        w_p = jnp.pad(weight, ((0, 0), (0, F_out_p - F_out))).astype(text.dtype)
        hidden = _matmul_bias(
            text_p, w_p, jnp.zeros((1, F_out_p), jnp.float32),
            text.dtype, tile_row, tile_n, budget,
        )
        out_p = _aggregate(adj_p, hidden, bias_out, out_dtype, tile_row, tile_k, budget)
    else:
        # Order B (F_in < F_out): (adj@(text@W))/d == ((adj@text)/d)@W, so the
        # O(N^2) aggregation and the streamed intermediate scale with F_in.
        F_in_p = _round_up(F_in, 128)
        text_p = jnp.pad(text, ((0, 0), (0, N_p - N), (0, F_in_p - F_in)))
        agg = _aggregate(
            adj_p, text_p, jnp.zeros((1, F_in_p), jnp.float32),
            text.dtype, tile_row, tile_k, budget,
        )
        w_p = jnp.pad(
            weight, ((0, F_in_p - F_in), (0, F_out_p - F_out))
        ).astype(text.dtype)
        out_p = _matmul_bias(agg, w_p, bias_out, out_dtype, tile_row, tile_n, budget)

    # Slice away N / F_out padding.
    return out_p[:, :N, :F_out]


# -------------------------------- reference ---------------------------------
def reference(text, adj, weight, bias=None):
    hidden = jnp.matmul(text, weight)
    denom = jnp.sum(adj, axis=2, keepdims=True) + 1.0
    out = jnp.matmul(adj, hidden) / denom
    if bias is not None:
        out = out + bias
    return out


if __name__ == "__main__":
    key = jax.random.PRNGKey(0)

    def run_case(idx, B, N, F_in, F_out, use_bias):
        ks = jax.random.split(jax.random.fold_in(key, idx), 4)
        text = jax.random.normal(ks[0], (B, N, F_in), dtype=jnp.float32)
        adj = jax.random.uniform(ks[1], (B, N, N), dtype=jnp.float32)
        weight = jax.random.normal(ks[2], (F_in, F_out), dtype=jnp.float32) * 0.1
        bias = (
            jax.random.normal(ks[3], (F_out,), dtype=jnp.float32) * 0.1
            if use_bias
            else None
        )
        out = jax.block_until_ready(graph_convolution(text, adj, weight, bias))
        ref = reference(text, adj, weight, bias)
        assert out.shape == ref.shape, f"case {idx}: shape {out.shape} vs {ref.shape}"
        assert jnp.allclose(out, ref, atol=1e-4, rtol=1e-4), f"case {idx}: mismatch"

    run_case(0, 2, 8, 16, 32, True)     # F_in < F_out: aggregate-first order, bias
    run_case(1, 2, 8, 16, 32, False)    # no-bias path
    run_case(2, 2, 8, 32, 16, True)     # F_out <= F_in: project-first order
    run_case(3, 1, 520, 16, 64, True)   # ragged N, multi-k loop, resident hidden
    run_case(4, 1, 520, 64, 32, True)   # ragged N, project-first order
    print("KERNEL_OK")
</pallas_src>

<mosaic_0001>
module attributes {stable_mosaic.version = 11 : i64} {
  func.func @kernel(%arg0: i32, %arg1: i32, %arg2: i32, %arg3: memref<1x8x8xf32, #tpu.memory_space<vmem>>, %arg4: memref<1x8x128xf32, #tpu.memory_space<vmem>>, %arg5: memref<1x128xf32, #tpu.memory_space<vmem>>, %arg6: memref<1x8x128xf32, #tpu.memory_space<vmem>>, %arg7: memref<8x128xf32, #tpu.memory_space<vmem>>, %arg8: memref<8x1xf32, #tpu.memory_space<vmem>>) attributes {dimension_semantics = [#tpu.dimension_semantics<parallel>, #tpu.dimension_semantics<parallel>, #tpu.dimension_semantics<arbitrary>], iteration_bounds = array<i64: 2, 1, 1>, scalar_prefetch = 0 : i64, scratch_operands = 2 : i64, tpu.core_type = #tpu.core_type<tc>, window_params = [{transform_indices = @transform_0, window_bounds = array<i64: 1, 8, 8>}, {transform_indices = @transform_1, window_bounds = array<i64: 1, 8, 128>}, {pipeline_mode = #tpu.pipeline_mode<synchronous>, transform_indices = @transform_2, window_bounds = array<i64: 1, 128>}, {transform_indices = @transform_3, window_bounds = array<i64: 1, 8, 128>}]} {
    %c0_i32 = arith.constant 0 : i32
    %0 = arith.cmpi eq, %arg2, %c0_i32 : i32
    %1 = arith.extui %0 : i1 to i32
    %c0_i32_0 = arith.constant 0 : i32
    %2 = arith.cmpi ne, %1, %c0_i32_0 : i32
    scf.if %2 {
      %cst_16 = arith.constant 0.000000e+00 : f32
      %22 = vector.broadcast %cst_16 : f32 to vector<8x128xf32>
      %c0_17 = arith.constant 0 : index
      %c0_18 = arith.constant 0 : index
      %23 = vector.load %arg7[%c0_17, %c0_18] : memref<8x128xf32, #tpu.memory_space<vmem>>, vector<8x128xf32>
      tpu.vector_store %arg7[%c0_17, %c0_18], %22 {strides = array<i32>} : memref<8x128xf32, #tpu.memory_space<vmem>>, vector<8x128xf32>,
      %cst_19 = arith.constant 0.000000e+00 : f32
      %24 = vector.broadcast %cst_19 : f32 to vector<8x1xf32>
      %c0_20 = arith.constant 0 : index
      %c0_21 = arith.constant 0 : index
      %25 = vector.load %arg8[%c0_20, %c0_21] : memref<8x1xf32, #tpu.memory_space<vmem>>, vector<8x1xf32>
      tpu.vector_store %arg8[%c0_20, %c0_21], %24 {strides = array<i32>} : memref<8x1xf32, #tpu.memory_space<vmem>>, vector<8x1xf32>,
    } else {
    }
    %c0 = arith.constant 0 : index
    %c0_1 = arith.constant 0 : index
    %c0_2 = arith.constant 0 : index
    %3 = vector.load %arg3[%c0, %c0_1, %c0_2] : memref<1x8x8xf32, #tpu.memory_space<vmem>>, vector<1x8x8xf32>
    %4 = vector.shape_cast %3 : vector<1x8x8xf32> to vector<8x8xf32>
    %c8_i32 = arith.constant 8 : i32
    %5 = arith.muli %arg2, %c8_i32 : i32
    %6 = tpu.assume_multiple %5, 8 : i32
    %c0_3 = arith.constant 0 : index
    %7 = arith.index_cast %6 : i32 to index
    %c0_4 = arith.constant 0 : index
    %8 = vector.load %arg4[%c0_3, %7, %c0_4] : memref<1x8x128xf32, #tpu.memory_space<vmem>>, vector<1x8x128xf32>
    %9 = vector.shape_cast %8 : vector<1x8x128xf32> to vector<8x128xf32>
    %c0_5 = arith.constant 0 : index
    %c0_6 = arith.constant 0 : index
    %10 = vector.load %arg7[%c0_5, %c0_6] : memref<8x128xf32, #tpu.memory_space<vmem>>, vector<8x128xf32>
    %cst = arith.constant dense<0.000000e+00> : vector<8x128xf32>
    %11 = tpu.matmul %4, %9, %cst {dimension_numbers = #tpu.dot_dimension_numbers<[1], [0], [0], [1], [0, 0, 1, 1], [], []>} : vector<8x8xf32>, vector<8x128xf32>, vector<8x128xf32> -> vector<8x128xf32>
    %12 = arith.addf %10, %11 : vector<8x128xf32>
    %c0_7 = arith.constant 0 : index
    %c0_8 = arith.constant 0 : index
    %13 = vector.load %arg7[%c0_7, %c0_8] : memref<8x128xf32, #tpu.memory_space<vmem>>, vector<8x128xf32>
    tpu.vector_store %arg7[%c0_7, %c0_8], %12 {strides = array<i32>} : memref<8x128xf32, #tpu.memory_space<vmem>>, vector<8x128xf32>,
    %c0_9 = arith.constant 0 : index
    %c0_10 = arith.constant 0 : index
    %14 = vector.load %arg8[%c0_9, %c0_10] : memref<8x1xf32, #tpu.memory_space<vmem>>, vector<8x1xf32>
    %cst_11 = arith.constant dense<0.000000e+00> : vector<8xf32>
    %15 = vector.multi_reduction <add>, %4, %cst_11 [1] : vector<8x8xf32> to vector<8xf32>
    %16 = vector.shape_cast %15 : vector<8xf32> to vector<8x1xf32>
    %17 = arith.addf %14, %16 : vector<8x1xf32>
    %c0_12 = arith.constant 0 : index
    %c0_13 = arith.constant 0 : index
    %18 = vector.load %arg8[%c0_12, %c0_13] : memref<8x1xf32, #tpu.memory_space<vmem>>, vector<8x1xf32>
    tpu.vector_store %arg8[%c0_12, %c0_13], %17 {strides = array<i32>} : memref<8x1xf32, #tpu.memory_space<vmem>>, vector<8x1xf32>,
    %c0_i32_14 = arith.constant 0 : i32
    %19 = arith.cmpi eq, %arg2, %c0_i32_14 : i32
    %20 = arith.extui %19 : i1 to i32
    %c0_i32_15 = arith.constant 0 : i32
    %21 = arith.cmpi ne, %20, %c0_i32_15 : i32
    scf.if %21 {
      %c0_16 = arith.constant 0 : index
      %c0_17 = arith.constant 0 : index
      %22 = vector.load %arg8[%c0_16, %c0_17] : memref<8x1xf32, #tpu.memory_space<vmem>>, vector<8x1xf32>
      %cst_18 = arith.constant 1.000000e+00 : f32
      %23 = vector.broadcast %cst_18 : f32 to vector<8x1xf32>
      %24 = arith.addf %22, %23 : vector<8x1xf32>
      %c0_19 = arith.constant 0 : index
      %c0_20 = arith.constant 0 : index
      %25 = vector.load %arg7[%c0_19, %c0_20] : memref<8x128xf32, #tpu.memory_space<vmem>>, vector<8x128xf32>
      %26 = vector.broadcast %24 : vector<8x1xf32> to vector<8x128xf32>
      %27 = arith.divf %25, %26 : vector<8x128xf32>
      %c0_21 = arith.constant 0 : index
      %c0_22 = arith.constant 0 : index
      %28 = vector.load %arg5[%c0_21, %c0_22] : memref<1x128xf32, #tpu.memory_space<vmem>>, vector<1x128xf32>
      %29 = vector.broadcast %28 : vector<1x128xf32> to vector<8x128xf32>
      %30 = arith.addf %27, %29 : vector<8x128xf32>
      %c0_23 = arith.constant 0 : index
      %c0_24 = arith.constant 0 : index
      %c0_25 = arith.constant 0 : index
      %31 = vector.load %arg6[%c0_23, %c0_24, %c0_25] : memref<1x8x128xf32, #tpu.memory_space<vmem>>, vector<1x8x128xf32>
      %32 = vector.shape_cast %31 : vector<1x8x128xf32> to vector<8x128xf32>
      %33 = vector.shape_cast %30 : vector<8x128xf32> to vector<1x8x128xf32>
      tpu.vector_store %arg6[%c0_23, %c0_24, %c0_25], %33 {strides = array<i32>} : memref<1x8x128xf32, #tpu.memory_space<vmem>>, vector<1x8x128xf32>,
    } else {
    }
    return
  }
  func.func @transform_0(%arg0: i32, %arg1: i32, %arg2: i32) -> (i32, i32, i32) {
    %c0_i32 = arith.constant 0 : i32
    return %arg0, %arg1, %arg2 : i32, i32, i32
  }
  func.func @transform_1(%arg0: i32, %arg1: i32, %arg2: i32) -> (i32, i32, i32) {
    %c0_i32 = arith.constant 0 : i32
    %c0_i32_0 = arith.constant 0 : i32
    %c0_i32_1 = arith.constant 0 : i32
    return %arg0, %c0_i32, %c0_i32_0 : i32, i32, i32
  }
  func.func @transform_2(%arg0: i32, %arg1: i32, %arg2: i32) -> (i32, i32) {
    %c0_i32 = arith.constant 0 : i32
    %c0_i32_0 = arith.constant 0 : i32
    %c0_i32_1 = arith.constant 0 : i32
    return %c0_i32, %c0_i32_0 : i32, i32
  }
  func.func @transform_3(%arg0: i32, %arg1: i32, %arg2: i32) -> (i32, i32, i32) {
    %c0_i32 = arith.constant 0 : i32
    %c0_i32_0 = arith.constant 0 : i32
    return %arg0, %arg1, %c0_i32 : i32, i32, i32
  }
}

</mosaic_0001>

<bundles_post_ra>
// kernel: tpu_custom_call.1
= control target key start
LH: loop header
LB: loop body
LE: loop exit
PB: predicated region body
PF: predicated region fallthrough
CT: control target
= control target key end

     0   :  { %8 = vsyncpa [#allocation5], 0  ;;  %s993_s0 = inlined_call_operand.hbm [shape: f32[2,8,8], index: 0, kind: input, shape index: {}]   ;;  %s994_s1 = inlined_call_operand.hbm [shape: f32[2,8,128], index: 1, kind: input, shape index: {}]   ;;  %s995_s2 = inlined_call_operand.vmem [shape: f32[1,128], index: 2, kind: input, shape index: {}]   ;;  %s996_s3 = inlined_call_operand.hbm [shape: f32[2,8,128], index: 3, kind: output, shape index: {}]  }
   0x1   :  { %10 = vsyncpa [#allocation5 + $0x1], 0 }
   0x2   :  { %11 = vsyncpa [#allocation8], 0 }
   0x3   :  { %13 = vsyncpa [#allocation8 + $0x1], 0 }
   0x4   :  { %14 = vsyncpa [#allocation6], 0 }
   0x5   :  { %16 = vsyncpa [#allocation6 + $0x1], 0  ;;  %s763_s12 = smov 0   ;;  %s765_s13 = smov 0  }
   0x6   :  { %s767_s14 = smov 0   ;;  %s769_s15 = smov 0  }
   0x7   :  { %s771_s16 = smov 0   ;;  %s773_s17 = smov 0  }
   0x8 LB: > { %s491_s18 = sadd.s32 4294967295, %s735_s17   ;;  %s492_s19 = sadd.s32 4294967294, %s735_s17   ;;  %s735_s17 = sphi %s773_s17, %s22_s17   ;;  %s731_s16 = sphi %s771_s16, %s1016_s16   ;;  %s727_s15 = sphi %s769_s15, %s1015_s15   ;;  %s723_s14 = sphi %s767_s14, %s1014_s14   ;;  %s719_s13 = sphi %s765_s13, %s1013_s13   ;;  %s715_s12 = sphi %s763_s12, %s1012_s12  }
   0x9   : > { %s41_s20 = sadd.s32 1, %s731_s16  ;;  %s52_s21 = sadd.s32 1, %s723_s14 }
   0xa   : > { %p43_p0 = scmp.ge.s32.totalorder %s41_s20, 2  ;;  %p59_p1 = scmp.ne.s32.totalorder %s723_s14, %s719_s13 }
   0xb   : > { %p60_p2 = scmp.eq.s32.totalorder %s735_s17, 0  ;;  %p65_p3 = scmp.ne.s32.totalorder %s719_s13, %s715_s12 }
   0xc   : > { %s1018_s20 = smov (%p43_p0, %s41_s20), 0  ;;  %p66_p5 = scmp.eq.s32.totalorder %s491_s18, 0 }
   0xd   : > { %p804_p4 = por %p60_p2, %p59_p1  ;;  %s45_s23 = ssub.s32 %s731_s16, %s1018_s20 }
   0xe   : > { %p138_p6 = scmp.eq.s32.totalorder %s491_s18, 1  ;;  %p50_p7 = scmp.eq.s32.totalorder %s45_s23, 0 }
   0xf   : > { %p810_p8 = por %p66_p5, %p65_p3  ;;  %p144_p10 = scmp.eq.s32.totalorder %s492_s19, 1 }
  0x10   : > { %p814_p9 = por %p138_p6, %p59_p1  ;;  %p533_p13 = scmp.lt.s32.totalorder %s735_s17, 2 }
  0x11   : > { %s1000_s24 = scalar_select %p810_p8, 1, 0 }
  0x12   : > { %s1001_s25 = scalar_select %p814_p9, 1, 0 }
  0x13   : > { %s819_s26 = scalar_select %p50_p7, %s723_s14, %s52_s21  }
  0x14   : > { %p821_p11 = por %p144_p10, %p65_p3  ;;  %s828_s28 = sand.u32 1, %s723_s14  }
  0x15   : > { %s495_s29 = sshll.u32 %s828_s28, 3  ;;  %s496_s30 = sshll.u32 %s731_s16, 7 }
  0x16   : > { %s1002_s27 = scalar_select %p821_p11, 1, 0 }
  0x17   : > { %s837_s6 = scalar_lea.hbm %s993_s0, %s496_s30  ;;  %s171_s7 = scalar_lea.vmem [#allocation4], %s495_s29 }
  0x18   : > { %s180_s8 = sshll.u32 %s171_s7, 4  ;;  %p845_p0 = pnand %p533_p13, %p804_p4  ;;  %s841_s8 = int_to_ptr.vmem [resolvable:$true] %s180_s8 }
  0x19   : > { %s168_s10 = scalar_lea.sflag [#allocation5], %s828_s28  ;;  %s589_s11 = scalar_lea.hbm %s837_s6, 128 }
  0x1a   : > { %p590_p3 = scmp.ne.s32.totalorder %s837_s6, %s589_s11  ;;  %p591_p5 = pneg %p845_p0 }
  0x1b   : > { %s594_s21 = scalar_lea.hbm %s993_s0, 256  ;;  %p595_p4 = scmp.lt.u32.totalorder %s837_s6, %s993_s0 }
  0x1c   : > { %p592_p6 = pnand %p591_p5, %p590_p3  ;;  %p596_p10 = scmp.lt.u32.totalorder %s594_s21, %s589_s11 }
  0x1d   : > { %p598_p12 = scmp.lt.u32.totalorder %s589_s11, %s837_s6 }
  0x1e   : > { %p593_p7 = pneg %p592_p6  ;;  %p597_p13 = por %p596_p10, %p595_p4 }
  0x20   : > { %p599_p1 = por %p598_p12, %p597_p13 }
  0x22   : > { %p600_p2 = pnand %p599_p1, %p593_p7 }
  0x24   : > { %603 = shalt.err (!%p600_p2)
}
  0x25   : > { %s604_s4 = scalar_lea.vmem %s841_s8, 128  ;;  %s737_s5 = smov [#allocation4]  }
  0x26   : > { %p605_p3 = scmp.ne.s32.totalorder %s841_s8, %s604_s4  ;;  %s609_s7 = sshll.u32 %s737_s5, 4  ;;  %s610_s7 = int_to_ptr.vmem [resolvable:$false] %s609_s7 }
  0x27   : > { %s611_s18 = scalar_lea.vmem %s610_s7, 256  ;;  %p612_p9 = scmp.lt.s32.totalorder %s841_s8, %s610_s7 }
  0x28   : > { %p607_p6 = pnand %p605_p3, %p591_p5  ;;  %p613_p4 = scmp.lt.s32.totalorder %s611_s18, %s604_s4 }
  0x2a   : > { %p608_p11 = pneg %p607_p6  ;;  %p614_p10 = por %p613_p4, %p612_p9 }
  0x2c   : > { %p615_p12 = pnand %p614_p10, %p608_p11 }
  0x2e   : > { %618 = shalt.err (!%p615_p12)
}
  0x2f   : > { %525 = dma.hbm_to_vmem [thread:$0]  (!%p845_p0), %s837_s6, 128, %s841_s8, %s168_s10  }
  0x30   : > { %p1004_p1 = scmp.lt.s32.totalorder %s735_s17, 3  ;;  %p1005_p2 = scmp.ge.s32.totalorder %s735_s17, 1 }
  0x31   : > { %s890_s22 = scalar_lea.hbm %s994_s1, %s496_s30  ;;  %s191_s23 = scalar_lea.vmem [#allocation7], %s495_s29 }
  0x32   : > { %p881_p7 = pnand %p1005_p2, %p1004_p1  ;;  %s198_s4 = sshll.u32 %s191_s23, 4  ;;  %s199_s4 = int_to_ptr.vmem [resolvable:$true] %s198_s4 }
  0x33   : > { %s188_s6 = scalar_lea.sflag [#allocation8], %s828_s28  ;;  %s619_s8 = scalar_lea.hbm %s890_s22, 128 }
  0x34   : > { %s1006_s11 = scalar_select %p881_p7, 1, 0 }
  0x35   : > { %p620_p9 = scmp.ne.s32.totalorder %s890_s22, %s619_s8  ;;  %s624_s30 = scalar_lea.hbm %s994_s1, 256 }
  0x36   : > { %p625_p3 = scmp.lt.u32.totalorder %s890_s22, %s994_s1  ;;  %p626_p6 = scmp.lt.u32.totalorder %s624_s30, %s619_s8 }
  0x37   : > { %p622_p11 = pnand %p620_p9, %p591_p5  ;;  %p628_p10 = scmp.lt.u32.totalorder %s619_s8, %s890_s22 }
  0x38   : > { %p627_p4 = por %p626_p6, %p625_p3 }
  0x39   : > { %p623_p13 = pneg %p622_p11 }
  0x3a   : > { %p629_p12 = por %p628_p10, %p627_p4 }
  0x3c   : > { %p630_p1 = pnand %p629_p12, %p623_p13 }
  0x3e   : > { %633 = shalt.err (!%p630_p1)
}
  0x3f   : > { %s634_s28 = scalar_lea.vmem %s199_s4, 128  ;;  %s738_s29 = smov [#allocation7]  }
  0x40   : > { %p635_p2 = scmp.ne.s32.totalorder %s199_s4, %s634_s28  ;;  %s639_s19 = sshll.u32 %s738_s29, 4  ;;  %s640_s19 = int_to_ptr.vmem [resolvable:$false] %s639_s19 }
  0x41   : > { %s641_s21 = scalar_lea.vmem %s640_s19, 256  ;;  %p642_p8 = scmp.lt.s32.totalorder %s199_s4, %s640_s19 }
  0x42   : > { %p637_p9 = pnand %p635_p2, %p591_p5  ;;  %p643_p7 = scmp.lt.s32.totalorder %s641_s21, %s634_s28 }
  0x44   : > { %p638_p11 = pneg %p637_p9  ;;  %p644_p3 = por %p643_p7, %p642_p8 }
  0x46   : > { %p645_p6 = pnand %p644_p3, %p638_p11 }
  0x48   : > { %648 = shalt.err (!%p645_p6)
}
  0x49   : > { %528 = dma.hbm_to_vmem [thread:$0]  (!%p845_p0), %s890_s22, 128, %s199_s4, %s188_s6  }
  0x4a   : > { %p1007_p13 = scmp.ne.s32.totalorder %s1006_s11, 0 }
  0x4b   : > { %s917_s23 = sand.u32 (!%p1007_p13), 1, %s719_s13   ;;  %p1008_p8 = scmp.ne.s32.totalorder (!%p1007_p13), %s1000_s24, 0 }
  0x4c   : > { %207 = sbr.rel (%p1007_p13) target bundleno = 399 (0x18f), region = 32  ;;  %s920_s8 = sshll.u32 (!%p1007_p13), %s917_s23, 3 }
  0x4d   : > { %s210_s10 = scalar_lea.sflag (!%p1007_p13), [#allocation5], %s917_s23  ;;  %s213_s5 = scalar_lea.vmem (!%p1007_p13), [#allocation4], %s920_s8 }
  0x53   : > { %702 = dma.done.wait (%p1008_p8), %s210_s10, 128  }
  0x54   : > { %704 = vsyncadd (%p1008_p8), %s210_s10, 4294967168  ;;  %s219_s9 = scalar_lea.sflag [#allocation8], %s917_s23  ;;  %s222_s11 = scalar_lea.vmem [#allocation7], %s920_s8 }
  0x55   : > { %706 = dma.done.wait (%p1008_p8), %s219_s9, 128  }
  0x56   : > { %708 = vsyncadd (%p1008_p8), %s219_s9, 4294967168  ;;  %vm255_vm0 = vcmask 7168   ;;  %v739_v0 = vmov 0.0   ;;  %vm740_vm1 = vmmov 0   ;;  %vm262_vm2 = vcmask 64512   ;;  %v257_v1 = vld [vmem:[%s213_s5] sm:$0xff] }
  0x57   : > { %256 = vst.msk [vmem:[#allocation3] sm:$0xff] %vm255_vm0, %v739_v0  ;;  %511 = vmatprep.subr.mxu0 %v739_v0  ;;  %513 = vmatprep.mubr.msk.f32.mxu0 %vm740_vm1, %v739_v0  ;;  %v260_v2 = vld [vmem:[%s222_s11] sm:$0xff]  ;;  %v339_v3 = vsel %vm262_vm2, %v257_v1, 0.0  ;;  %v741_v4 = vmov 0   ;;  %s506_s4 = sshll.u32 %s727_s15, 7  ;;  %s249_s6 = scalar_lea.vmem [#allocation9], %s920_s8 }
  0x58   : > { %512 = vmatpush3.msra.mxu0 %v260_v2  ;;  %340 = vadd.xlane.f32.xlu0 %v339_v3  ;;  %v504_v14 = vld [vmem:[%s995_s2] ss:$0 sm:$0xff]  ;;  %s382_s30 = sshll.u32 %s249_s6, 4  ;;  %s944_s28 = scalar_lea.hbm %s996_s3, %s506_s4  ;;  %s946_s30 = int_to_ptr.vmem [resolvable:$true] %s382_s30 }
  0x59   : > { %514 = vmatmul.mubr.msk.f32.vlgmr.msra.gmra.mrb[0].mxu0 %vm262_vm2, %v257_v1  ;;  %586 = vset.pattern.permute.xlu0 %v741_v4  ;;  %s368_s29 = scalar_lea.sflag [#allocation6], %s917_s23  ;;  %s649_s19 = scalar_lea.vmem %s946_s30, 128 }
  0x5a   : > { %p650_p0 = scmp.ne.s32.totalorder %s946_s30, %s649_s19  ;;  %p1009_p5 = scmp.ne.s32.totalorder %s1001_s25, 0 }
  0x5b   : > { %s742_s15 = smov [#allocation9]  }
  0x5c   : > { %p651_p7 = pnand %p650_p0, %p1009_p5  ;;  %s653_s21 = sshll.u32 %s742_s15, 4  ;;  %s654_s21 = int_to_ptr.vmem [resolvable:$false] %s653_s21 }
  0x5d   : > { %s655_s8 = scalar_lea.vmem %s654_s21, 256  ;;  %p656_p10 = scmp.lt.s32.totalorder %s946_s30, %s654_s21 }
  0x5e   : > { %v338_v5 = vld [vmem:[#allocation3] sm:$0xff]  ;;  %p652_p4 = pneg %p651_p7  ;;  %p657_p12 = scmp.lt.s32.totalorder %s655_s8, %s649_s19 }
  0x60   : > { %p658_p1 = por %p657_p12, %p656_p10 }
  0x62   : > { %p659_p2 = pnand %p658_p1, %p652_p4 }
  0xe5   : > { %v341_v6 = vpop.xlane.xlu0 %340 }
  0xe6   : > { %v342_v7 = vadd.f32 %v341_v6, %v338_v5 }
  0xe8   : > { %344 = vst.msk [vmem:[#allocation3] sm:$0xff] %vm255_vm0, %v342_v7 }
  0xef   : > { %v348_v8 = vld [vmem:[#allocation3] sm:$0xff] }
  0xf0   : > { %v349_v9 = vadd.f32 1.0, %v348_v8 }
  0xf2   : > { %353 = vperm.xlu0 %586, %v349_v9  }
 0x12c   : > { %v332_v10 = vpop.f32.mrb[0].mxu0 }
 0x12d   : > { %v515_v11 = vpop.f32.mrb[1].mxu0 }
 0x171   : > { %v354_v12 = vpop.permute.xlu0 %353 }
 0x172   : > { %587 = vrcp.f32 %v354_v12 }
 0x17c   : > { %v588_v13 = vpop.eup %587 }
 0x17d   : > { %v357_v15 = vmul.f32 %v588_v13, %v332_v10 }
 0x17f   : > { %v365_v16 = vadd.f32 %v504_v14, %v357_v15 }
 0x181   : > { %366 = vst [vmem:[%s249_s6] sm:$0xff] %v365_v16 }
 0x182   : > { %662 = shalt.err (!%p659_p2)
}
 0x183   : > { %s663_s23 = scalar_lea.hbm %s944_s28, 128  ;;  %s667_s9 = scalar_lea.hbm %s996_s3, 256 }
 0x184   : > { %p664_p9 = scmp.ne.s32.totalorder %s944_s28, %s663_s23  ;;  %p668_p6 = scmp.lt.u32.totalorder %s944_s28, %s996_s3 }
 0x185   : > { %p669_p13 = scmp.lt.u32.totalorder %s667_s9, %s663_s23  ;;  %p671_p0 = scmp.lt.u32.totalorder %s663_s23, %s944_s28 }
 0x186   : > { %p665_p11 = pnand %p664_p9, %p1009_p5 }
 0x187   : > { %p670_p8 = por %p669_p13, %p668_p6 }
 0x188   : > { %p666_p3 = pneg %p665_p11 }
 0x189   : > { %p672_p7 = por %p671_p0, %p670_p8 }
 0x18b   : > { %p673_p4 = pnand %p672_p7, %p666_p3 }
 0x18d   : > { %676 = shalt.err (!%p673_p4)
}
 0x18e   : > { %520 = dma.vmem_to_hbm [thread:$0]  (%p1009_p5), %s946_s30, 128, %s944_s28, %s368_s29  }
 0x18f PF: > { %s394_s22 = sand.u32 1, %s715_s12   ;;  %p1010_p10 = scmp.ne.s32.totalorder %s1002_s27, 0 }
 0x190   : > { %p1011_p12 = scmp.ge.s32.totalorder %s735_s17, 2  ;;  %s395_s4 = scalar_lea.sflag [#allocation6], %s394_s22 }
 0x192   : > { %p530_p1 = pnand %p1011_p12, %p1010_p10 }
 0x194   : > { %710 = dma.done.wait (!%p530_p1), %s395_s4, 128  }
 0x195   : > { %712 = vsyncadd (!%p530_p1), %s395_s4, 4294967168  ;;  %s22_s17 = sadd.s32 1, %s735_s17   ;;  %s1012_s12 = smov %s719_s13 }
 0x196   : > { %p19_p2 = scmp.ge.s32.totalorder %s22_s17, 4   ;;  %s1013_s13 = smov %s723_s14 }
 0x197   : > { %s1014_s14 = smov %s819_s26  ;;  %s1015_s15 = smov %s731_s16 }
 0x198   : > { %s1016_s16 = smov %s1018_s20  ;;  %21 = sbr.rel (!%p19_p2) target bundleno = 8 (0x8), region = 99 }
 0x19f   :  { %400 = vsyncpa [#allocation5], 1 }
 0x1a0   :  { %402 = vsyncpa [#allocation5 + $0x1], 1 }
 0x1a1   :  { %403 = vsyncpa [#allocation8], 1 }
 0x1a2   :  { %405 = vsyncpa [#allocation8 + $0x1], 1 }
 0x1a3   :  { %406 = vsyncpa [#allocation6], 1 }
 0x1a4   :  { %408 = vsyncpa [#allocation6 + $0x1], 1 }

</bundles_post_ra>
